<compile_context>
chip_gen: v7x
topology: tpu7x:2x2x1
jax: 0.10.0
libtpu: 0.0.40
codegen_flags: <defaults>
</compile_context>

<pallas_src>
import jax
import jax.numpy as jnp
from jax.experimental import pallas as pl
from jax.experimental.pallas import tpu as pltpu


def _round_up(x: int, m: int) -> int:
    return ((x + m - 1) // m) * m


def _value_head_kernel(x_ref, w1_ref, b1_ref, w2_ref, b2_ref, o_ref, acc_ref):
    # x_ref:   (TM, D)   row tile of the flattened input, matmul dtype (f32 / bf16)
    # w1_ref:  (TN, D)   hidden-block of W1 in its native (out, in) layout
    # b1_ref:  (TN, 1)   f32 slice of the first Linear's bias
    # w2_ref:  (TN, 1)   f32 slice of the second Linear's weight row
    # b2_ref:  (1,)      f32 scalar bias of the second Linear (SMEM)
    # o_ref:   (1, TM)   lane-dense output slice for this row tile
    # acc_ref: (1, TM)   f32 running sum over hidden blocks (already lane-dense)
    n = pl.program_id(1)

    @pl.when(n == 0)
    def _init():
        acc_ref[...] = jnp.zeros_like(acc_ref)

    # First Linear on the MXU, transposed orientation: h^T = W1_blk @ x^T.
    # Both operands keep their native layouts (NT matmul); f32 accumulation.
    ht = jax.lax.dot_general(
        w1_ref[...], x_ref[...],
        dimension_numbers=(((1,), (1,)), ((), ())),
        preferred_element_type=jnp.float32,
    )                                                    # (TN, TM) f32
    ht = jnp.tanh(ht + b1_ref[...])                      # bias + tanh (EUP), f32

    # Second Linear (D -> 1): scale by w2 and reduce over the hidden (sublane) axis.
    # The result is already (1, TM) lane-dense -> no relayout on the accumulation path.
    acc_ref[...] += jnp.sum(ht * w2_ref[...], axis=0, keepdims=True)

    @pl.when(n == pl.num_programs(1) - 1)
    def _finalize():
        o_ref[...] = (acc_ref[...] + b2_ref[0]).astype(o_ref.dtype)


def _tpu_vmem_capacity_bytes() -> int:
    try:
        info = pltpu.get_tpu_info()
        cap = int(getattr(info, "vmem_capacity_bytes", 0) or 0)
        if cap > 0:
            return cap
    except Exception:
        pass
    return 64 * 1024 * 1024      # conservative default (v7x-sized TensorCore)


def value_head_forward(hs, w1, b1, w2, b2, *, matmul_dtype="auto"):
    """ValueHead forward: tanh(hs @ w1.T + b1) @ w2.T + b2, squeezed on the last axis.

    hs: (..., d_model); w1: (d_model, d_model); b1: (d_model,); w2: (1, d_model);
    b2: (1,).  Returns an array of shape hs.shape[:-1] (same as PyTorch .squeeze(-1)).
    """
    lead_shape = hs.shape[:-1]
    d_model = hs.shape[-1]
    d_hidden = w1.shape[0]
    out_dtype = hs.dtype

    x = hs.reshape(-1, d_model)
    n_rows = x.shape[0]

    # ---- matmul dtype: optionally cast f32 streams to bf16 (halves the W1 HBM read,
    #      doubles arithmetic intensity); accumulation stays f32 either way. ----------
    if matmul_dtype == "auto":
        mm_dtype = (jnp.dtype(jnp.bfloat16)
                    if (jnp.dtype(hs.dtype) == jnp.dtype(jnp.float32) and d_model >= 1024)
                    else jnp.dtype(hs.dtype))
    elif matmul_dtype is None:
        mm_dtype = jnp.dtype(hs.dtype)
    else:
        mm_dtype = jnp.dtype(matmul_dtype)
    x = x.astype(mm_dtype)
    w1c = w1.astype(mm_dtype)            # native (out, in) layout -> no w1.T in HBM

    x_bytes = mm_dtype.itemsize
    w_bytes = mm_dtype.itemsize
    out_bytes = jnp.dtype(out_dtype).itemsize

    # ---- generation-aware budgets ----------------------------------------------------
    vmem_cap = _tpu_vmem_capacity_bytes()
    small_vmem = vmem_cap <= 80 * 1024 * 1024    # v7x-class TC (64 MiB physical)
    vmem_limit = max(32 * 1024 * 1024,
                     min(int(vmem_cap * 0.80), vmem_cap - 8 * 1024 * 1024))
    multi_core = small_vmem                      # v7x: 2 TensorCores per chip
    max_tm = 512 if small_vmem else 1024         # v6e/v5e (128 MiB) afford bigger rows
    tn_stream = 256 if small_vmem else 512

    # keep the x row tile's double buffer within ~half of the budget
    tm_cap = max(128, (vmem_limit // max(1, 4 * d_model * x_bytes)) // 128 * 128)
    max_tm = max(128, min(max_tm, tm_cap))

    # ---- row tiling -------------------------------------------------------------------
    rows8 = _round_up(max(n_rows, 1), 8)
    if rows8 <= max_tm and not (multi_core and rows8 >= 256):
        tm = rows8                               # single row tile (full extent)
    else:
        tm = min(max_tm, _round_up(rows8, 128))
        if multi_core:                           # guarantee grid_m >= 2 for both TCs
            tm = min(tm, _round_up((rows8 + 1) // 2, 128))
        tm = max(128, (tm // 128) * 128)
    n_padded = _round_up(n_rows, tm)
    grid_m = n_padded // tm

    # ---- hidden-dim tiling: keep W1 fully resident when it fits the VMEM budget ------
    def _fits(tn_, w_bufs):
        need = (w_bufs * tn_ * d_model * w_bytes     # W1 block buffer(s)
                + 2 * tm * d_model * x_bytes         # x row tile (double-buffered)
                + tm * tn_ * 4                       # f32 h^T slab
                + w_bufs * tn_ * 128 * 4 * 2         # b1/w2 blocks (lane-padded tiles)
                + 4 * tm                             # f32 accumulator
                + 2 * tm * out_bytes                 # output row buffers
                + (2 << 20))                         # compiler scratch headroom
        return need <= vmem_limit

    dh8 = _round_up(d_hidden, 8)
    if _fits(dh8, 2):
        tn, dh_p = dh8, dh8                          # grid_n = 1: W1 DMA'd once, resident
    else:
        tn = min(tn_stream, _round_up(d_hidden, 128))
        while tn > 128 and not _fits(tn, 2):
            tn -= 128
        tn = max(tn, 128)
        dh_p = _round_up(d_hidden, tn)
    grid_n = dh_p // tn

    # ---- pad operands (zero W1 rows / zero w2 entries contribute exactly 0) ----------
    if n_padded != n_rows:
        x = jnp.pad(x, ((0, n_padded - n_rows), (0, 0)))
    b1c = b1.reshape(d_hidden, 1).astype(jnp.float32)
    w2c = w2.reshape(d_hidden, 1).astype(jnp.float32)
    if dh_p != d_hidden:
        pad = dh_p - d_hidden
        w1c = jnp.pad(w1c, ((0, pad), (0, 0)))
        b1c = jnp.pad(b1c, ((0, pad), (0, 0)))
        w2c = jnp.pad(w2c, ((0, pad), (0, 0)))
    b2c = b2.reshape(1).astype(jnp.float32)

    # ---- cost estimate: W1 is re-read per row tile only when it is not resident ------
    w_passes = 1 if grid_n == 1 else grid_m
    cost = pl.CostEstimate(
        flops=2 * n_padded * d_model * dh_p + 3 * n_padded * dh_p,
        transcendentals=n_padded * dh_p,
        bytes_accessed=(n_padded * d_model * x_bytes
                        + w_passes * dh_p * d_model * w_bytes
                        + w_passes * 2 * dh_p * 4
                        + 4
                        + n_padded * out_bytes),
    )

    grid_spec = pltpu.PrefetchScalarGridSpec(
        num_scalar_prefetch=0,
        grid=(grid_m, grid_n),
        in_specs=[
            # x row tile: resident across the hidden axis (index constant in n).
            pl.BlockSpec((tm, d_model), lambda i, n: (i, 0)),
            # W1 hidden-block, native (out, in) layout -> streamed only if grid_n > 1.
            pl.BlockSpec((tn, d_model), lambda i, n: (n, 0)),
            pl.BlockSpec((tn, 1), lambda i, n: (n, 0)),
            pl.BlockSpec((tn, 1), lambda i, n: (n, 0)),
            # b2: a single f32 scalar, lives in SMEM.
            pl.BlockSpec(memory_space=pltpu.MemorySpace.SMEM),
        ],
        # Lane-dense (1, n_padded) output slab: one unmasked (1, tm) row per row tile.
        out_specs=pl.BlockSpec((1, tm), lambda i, n: (0, i)),
        scratch_shapes=[pltpu.VMEM((1, tm), jnp.float32)],
    )

    out = pl.pallas_call(
        _value_head_kernel,
        out_shape=jax.ShapeDtypeStruct((1, n_padded), out_dtype),
        grid_spec=grid_spec,
        compiler_params=pltpu.CompilerParams(
            dimension_semantics=("parallel", "arbitrary"),  # rows shard across TCs
            vmem_limit_bytes=int(vmem_limit),
        ),
        cost_estimate=cost,
    )(x, w1c, b1c, w2c, b2c)

    out = out.reshape(-1)[:n_rows]       # drop row padding; already squeezed(-1)
    return out.reshape(lead_shape)


if __name__ == "__main__":
    batch, seq, d_model = 2, 8, 32

    key = jax.random.PRNGKey(0)
    k_hs, k_w1, k_b1, k_w2, k_b2 = jax.random.split(key, 5)

    hs = jax.random.normal(k_hs, (batch, seq, d_model), dtype=jnp.float32)

    # Deterministic params matching nn.Linear(d_model, d_model) / nn.Linear(d_model, 1).
    bound1 = 1.0 / (d_model ** 0.5)
    w1 = jax.random.uniform(k_w1, (d_model, d_model), jnp.float32, -bound1, bound1)
    b1 = jax.random.uniform(k_b1, (d_model,), jnp.float32, -bound1, bound1)
    w2 = jax.random.uniform(k_w2, (1, d_model), jnp.float32, -bound1, bound1)
    b2 = jax.random.uniform(k_b2, (1,), jnp.float32, -bound1, bound1)

    out = value_head_forward(hs, w1, b1, w2, b2)
    out = jax.block_until_ready(out)

    # Pure-JAX reference (same math as the PyTorch module).
    ref = (jnp.tanh(hs @ w1.T + b1) @ w2.T + b2)[..., 0]
    assert out.shape == (batch, seq), out.shape
    assert jnp.allclose(out, ref, atol=1e-5, rtol=1e-5), float(jnp.max(jnp.abs(out - ref)))

    print("KERNEL_OK")
</pallas_src>

<mosaic_0001>
module attributes {stable_mosaic.version = 11 : i64} {
  func.func @_value_head_kernel(%arg0: i32, %arg1: i32, %arg2: memref<16x32xf32, #tpu.memory_space<vmem>>, %arg3: memref<32x32xf32, #tpu.memory_space<vmem>>, %arg4: memref<32x1xf32, #tpu.memory_space<vmem>>, %arg5: memref<32x1xf32, #tpu.memory_space<vmem>>, %arg6: memref<1xf32, #tpu.memory_space<smem>>, %arg7: memref<1x16xf32, #tpu.memory_space<vmem>>, %arg8: memref<1x16xf32, #tpu.memory_space<vmem>>) attributes {dimension_semantics = [#tpu.dimension_semantics<parallel>, #tpu.dimension_semantics<arbitrary>], iteration_bounds = array<i64: 1, 1>, scalar_prefetch = 0 : i64, scratch_operands = 1 : i64, tpu.core_type = #tpu.core_type<tc>, window_params = [{transform_indices = @transform_0, window_bounds = array<i64: 16, 32>}, {transform_indices = @transform_1, window_bounds = array<i64: 32, 32>}, {transform_indices = @transform_2, window_bounds = array<i64: 32, 1>}, {transform_indices = @transform_3, window_bounds = array<i64: 32, 1>}, {transform_indices = @transform_4, window_bounds = array<i64: 1>}, {transform_indices = @transform_5, window_bounds = array<i64: 1, 16>}]} {
    %c0_i32 = arith.constant 0 : i32
    %0 = arith.cmpi eq, %arg1, %c0_i32 : i32
    %1 = arith.extui %0 : i1 to i32
    %c0_i32_0 = arith.constant 0 : i32
    %2 = arith.cmpi ne, %1, %c0_i32_0 : i32
    scf.if %2 {
      %cst_15 = arith.constant 0.000000e+00 : f32
      %21 = vector.broadcast %cst_15 : f32 to vector<1x16xf32>
      %c0_16 = arith.constant 0 : index
      %c0_17 = arith.constant 0 : index
      %22 = vector.load %arg8[%c0_16, %c0_17] : memref<1x16xf32, #tpu.memory_space<vmem>>, vector<1x16xf32>
      tpu.vector_store %arg8[%c0_16, %c0_17], %21 {strides = array<i32>} : memref<1x16xf32, #tpu.memory_space<vmem>>, vector<1x16xf32>,
    } else {
    }
    %c0 = arith.constant 0 : index
    %c0_1 = arith.constant 0 : index
    %3 = vector.load %arg3[%c0, %c0_1] : memref<32x32xf32, #tpu.memory_space<vmem>>, vector<32x32xf32>
    %c0_2 = arith.constant 0 : index
    %c0_3 = arith.constant 0 : index
    %4 = vector.load %arg2[%c0_2, %c0_3] : memref<16x32xf32, #tpu.memory_space<vmem>>, vector<16x32xf32>
    %cst = arith.constant dense<0.000000e+00> : vector<32x16xf32>
    %5 = tpu.matmul %3, %4, %cst {dimension_numbers = #tpu.dot_dimension_numbers<[1], [1], [0], [0], [0, 0, 1, 0], [], []>} : vector<32x32xf32>, vector<16x32xf32>, vector<32x16xf32> -> vector<32x16xf32>
    %c0_4 = arith.constant 0 : index
    %c0_5 = arith.constant 0 : index
    %6 = vector.load %arg4[%c0_4, %c0_5] : memref<32x1xf32, #tpu.memory_space<vmem>>, vector<32x1xf32>
    %7 = vector.broadcast %6 : vector<32x1xf32> to vector<32x16xf32>
    %8 = arith.addf %5, %7 : vector<32x16xf32>
    %9 = math.tanh %8 : vector<32x16xf32>
    %c0_6 = arith.constant 0 : index
    %c0_7 = arith.constant 0 : index
    %10 = vector.load %arg8[%c0_6, %c0_7] : memref<1x16xf32, #tpu.memory_space<vmem>>, vector<1x16xf32>
    %c0_8 = arith.constant 0 : index
    %c0_9 = arith.constant 0 : index
    %11 = vector.load %arg5[%c0_8, %c0_9] : memref<32x1xf32, #tpu.memory_space<vmem>>, vector<32x1xf32>
    %12 = vector.broadcast %11 : vector<32x1xf32> to vector<32x16xf32>
    %13 = arith.mulf %9, %12 : vector<32x16xf32>
    %cst_10 = arith.constant dense<0.000000e+00> : vector<16xf32>
    %14 = vector.multi_reduction <add>, %13, %cst_10 [0] : vector<32x16xf32> to vector<16xf32>
    %15 = vector.shape_cast %14 : vector<16xf32> to vector<1x16xf32>
    %16 = arith.addf %10, %15 : vector<1x16xf32>
    %c0_11 = arith.constant 0 : index
    %c0_12 = arith.constant 0 : index
    %17 = vector.load %arg8[%c0_11, %c0_12] : memref<1x16xf32, #tpu.memory_space<vmem>>, vector<1x16xf32>
    tpu.vector_store %arg8[%c0_11, %c0_12], %16 {strides = array<i32>} : memref<1x16xf32, #tpu.memory_space<vmem>>, vector<1x16xf32>,
    %c0_i32_13 = arith.constant 0 : i32
    %18 = arith.cmpi eq, %arg1, %c0_i32_13 : i32
    %19 = arith.extui %18 : i1 to i32
    %c0_i32_14 = arith.constant 0 : i32
    %20 = arith.cmpi ne, %19, %c0_i32_14 : i32
    scf.if %20 {
      %c0_15 = arith.constant 0 : index
      %c0_16 = arith.constant 0 : index
      %21 = vector.load %arg8[%c0_15, %c0_16] : memref<1x16xf32, #tpu.memory_space<vmem>>, vector<1x16xf32>
      %c0_17 = arith.constant 0 : index
      %22 = memref.load %arg6[%c0_17] : memref<1xf32, #tpu.memory_space<smem>>
      %23 = vector.broadcast %22 : f32 to vector<1x16xf32>
      %24 = arith.addf %21, %23 : vector<1x16xf32>
      %c0_18 = arith.constant 0 : index
      %c0_19 = arith.constant 0 : index
      %25 = vector.load %arg7[%c0_18, %c0_19] : memref<1x16xf32, #tpu.memory_space<vmem>>, vector<1x16xf32>
      tpu.vector_store %arg7[%c0_18, %c0_19], %24 {strides = array<i32>} : memref<1x16xf32, #tpu.memory_space<vmem>>, vector<1x16xf32>,
    } else {
    }
    return
  }
  func.func @transform_0(%arg0: i32, %arg1: i32) -> (i32, i32) {
    %c0_i32 = arith.constant 0 : i32
    %c0_i32_0 = arith.constant 0 : i32
    return %arg0, %c0_i32 : i32, i32
  }
  func.func @transform_1(%arg0: i32, %arg1: i32) -> (i32, i32) {
    %c0_i32 = arith.constant 0 : i32
    %c0_i32_0 = arith.constant 0 : i32
    return %arg1, %c0_i32 : i32, i32
  }
  func.func @transform_2(%arg0: i32, %arg1: i32) -> (i32, i32) {
    %c0_i32 = arith.constant 0 : i32
    %c0_i32_0 = arith.constant 0 : i32
    return %arg1, %c0_i32 : i32, i32
  }
  func.func @transform_3(%arg0: i32, %arg1: i32) -> (i32, i32) {
    %c0_i32 = arith.constant 0 : i32
    %c0_i32_0 = arith.constant 0 : i32
    return %arg1, %c0_i32 : i32, i32
  }
  func.func @transform_4(%arg0: i32, %arg1: i32) -> i32 {
    %c0_i32 = arith.constant 0 : i32
    %c0_i32_0 = arith.constant 0 : i32
    return %c0_i32 : i32
  }
  func.func @transform_5(%arg0: i32, %arg1: i32) -> (i32, i32) {
    %c0_i32 = arith.constant 0 : i32
    %c0_i32_0 = arith.constant 0 : i32
    return %c0_i32, %arg0 : i32, i32
  }
}

</mosaic_0001>

<bundles_post_ra>
// kernel: tpu_custom_call.1
= control target key start
LH: loop header
LB: loop body
LE: loop exit
PB: predicated region body
PF: predicated region fallthrough
CT: control target
= control target key end

     0   :  { %vm58_vm0 = vcmask 261120   ;;  %v301_v5 = vmov 0   ;;  %s400_s0 = inlined_call_operand.vmem [shape: f32[16,32], index: 0, kind: input, shape index: {}]   ;;  %s401_s1 = inlined_call_operand.vmem [shape: f32[32,32], index: 1, kind: input, shape index: {}]   ;;  %s402_s2 = inlined_call_operand.vmem [shape: f32[32,1], index: 2, kind: input, shape index: {}]   ;;  %s403_s3 = inlined_call_operand.vmem [shape: f32[32,1], index: 3, kind: input, shape index: {}]   ;;  %s404_s4 = inlined_call_operand.<no memory space> [shape: f32[1], index: 4, kind: input, shape index: {}]   ;;  %s405_s5 = inlined_call_operand.hbm [shape: f32[1,16], index: 5, kind: output, shape index: {}]  }
   0x1   :  { %v32_v0 = vld [vmem:[%s400_s0] sm:$0xff]  ;;  %v33_v1 = vld [vmem:[%s400_s0 + $0x8] sm:$0xff]  ;;  %vm257_vm1 = vmpackc.low %vm58_vm0, %vm58_vm0  ;;  %267 = vset.pattern.permute.xlu0 %v301_v5  ;;  %268 = vset.pattern.permute.xlu1 %v301_v5 }
   0x2   :  { %v28_v2 = vld [vmem:[%s401_s1] sm:$0xff]  ;;  %v256_v3 = vpack.c.bf16 %v33_v1, %v32_v0  ;;  %v30_v4 = vld [vmem:[%s401_s1 + $0x10] sm:$0xff] }
   0x3   :  { %250 = vmatprep.mubr.msk.f32.mxu0 %vm58_vm0, %v28_v2  ;;  %253 = vmatprep.mubr.msk.f32.mxu1 %vm58_vm0, %v30_v4  ;;  %v34_v6 = vld [vmem:[%s402_s2] sm:$0xff]  ;;  %v36_v7 = vld [vmem:[%s402_s2 + $0x10] sm:$0xff] }
   0x4   :  { %258 = vmatprep.subr.msk.bf16.mxu0 %vm257_vm1, %v256_v3  ;;  %262 = vmatprep.subr.msk.bf16.mxu1 %vm257_vm1, %v256_v3 }
   0x5   :  { %261 = vmatpush3.bf16.xpose.msk.msra.mxu0 %vm257_vm1, %v256_v3  ;;  %263 = vmatpush3.bf16.xpose.msk.msra.mxu1 %vm257_vm1, %v256_v3 }
   0x6   :  { %40 = vperm.xlu0 %267, %v34_v6   ;;  %50 = vperm.xlu1 %268, %v36_v7  }
   0x7   :  { %11 = vsyncpa [#allocation5], 0  ;;  %v35_v8 = vld [vmem:[%s402_s2 + $0x8] sm:$0xff]  ;;  %v37_v9 = vld [vmem:[%s402_s2 + $0x18] sm:$0xff]  ;;  %vm26_vm2 = vcmask 122880   ;;  %v302_v16 = vmov 0.0   ;;  %v217_v56 = vstv %s404_s4 }
   0x8   :  { %v29_v10 = vld [vmem:[%s401_s1 + $0x8] sm:$0xff]  ;;  %v31_v11 = vld [vmem:[%s401_s1 + $0x18] sm:$0xff]  ;;  %v167_v12 = vld [vmem:[%s403_s3] sm:$0xff]  ;;  %27 = vst.msk [vmem:[#allocation2] sm:$0x1] %vm26_vm2, %v302_v16  ;;  %vm195_vm3 = vcmask 130048  }
   0x9   :  { %v168_v13 = vld [vmem:[%s403_s3 + $0x8] sm:$0xff]  ;;  %v169_v14 = vld [vmem:[%s403_s3 + $0x10] sm:$0xff]  ;;  %v170_v15 = vld [vmem:[%s403_s3 + $0x18] sm:$0xff]  ;;  %s303_s19 = smov [#allocation4]  }
   0xa   :  { %45 = vperm.xlu0 %267, %v35_v8   ;;  %55 = vperm.xlu1 %268, %v37_v9   ;;  %s226_s20 = sshll.u32 %s303_s19, 4  ;;  %s227_s20 = int_to_ptr.vmem [resolvable:$true] %s226_s20 }
   0xb   :  { %s277_s21 = scalar_lea.vmem %s227_s20, 16  ;;  %s281_s22 = scalar_lea.vmem %s227_s20, 32 }
   0xc   :  { %251 = vmatmul.mubr.msk.f32.vlgmr.msra.gmra.mrb[0].mxu0 %vm58_vm0, %v29_v10  ;;  %254 = vmatmul.mubr.msk.f32.vlgmr.msra.gmra.mrb[0].mxu1 %vm58_vm0, %v31_v11  ;;  %p278_p0 = scmp.ne.s32.totalorder %s227_s20, %s277_s21  ;;  %p282_p1 = scmp.lt.s32.totalorder %s227_s20, %s227_s20 }
   0xd   :  { %p283_p2 = scmp.lt.s32.totalorder %s281_s22, %s277_s21 }
   0xe   :  { %173 = vperm.xlu0 %267, %v167_v12   ;;  %178 = vperm.xlu1 %268, %v168_v13  }
   0xf   :  { %v166_v53 = vld [vmem:[#allocation2] sm:$0x1]  ;;  %p284_p3 = por %p283_p2, %p282_p1 }
  0x11   :  { %p285_p4 = pnand %p284_p3, %p278_p0 }
  0x12   :  { %183 = vperm.xlu0 %267, %v169_v14   ;;  %188 = vperm.xlu1 %268, %v170_v15  }
  0x85   :  { %v41_v17 = vpop.permute.xlu0 %40  ;;  %v51_v18 = vpop.permute.xlu1 %50 }
  0x89   :  { %v46_v19 = vpop.permute.xlu0 %45  ;;  %v56_v20 = vpop.permute.xlu1 %55 }
  0x8d   :  { %v174_v29 = vpop.permute.xlu0 %173  ;;  %v179_v30 = vpop.permute.xlu1 %178 }
  0x91   :  { %v184_v36 = vpop.permute.xlu0 %183  ;;  %v189_v39 = vpop.permute.xlu1 %188 }
  0xdf   :  { %v252_v21 = vpop.f32.mrb[0].mxu0  ;;  %v255_v22 = vpop.f32.mrb[0].mxu1 }
  0xe0   :  { %v149_v23 = vadd.f32 %v252_v21, %v46_v19  ;;  %v159_v24 = vadd.f32 %v255_v22, %v56_v20  ;;  %v143_v25 = vpop.f32.mrb[1].mxu0  ;;  %v153_v26 = vpop.f32.mrb[1].mxu1 }
  0xe1   :  { %v144_v27 = vadd.f32 %v143_v25, %v41_v17  ;;  %v154_v28 = vadd.f32 %v153_v26, %v51_v18 }
  0xe2   :  { %269 = vtanh.f32 %v149_v23 }
  0xe3   :  { %271 = vtanh.f32 %v159_v24 }
  0xe4   :  { %273 = vtanh.f32 %v144_v27 }
  0xe5   :  { %275 = vtanh.f32 %v154_v28 }
  0xec   :  { %v270_v31 = vpop.eup %269 }
  0xed   :  { %v272_v32 = vpop.eup %271  ;;  %v192_v33 = vmul.f32 %v270_v31, %v179_v30 }
  0xee   :  { %v274_v34 = vpop.eup %273  ;;  %v194_v41 = vmul.f32 %v272_v32, %v189_v39 }
  0xef   :  { %v276_v35 = vpop.eup %275  ;;  %v197_v37 = vsel %vm195_vm3, %v192_v33, 0.0  ;;  %v191_v38 = vmul.f32 %v274_v34, %v174_v29 }
  0xf0   :  { %v193_v40 = vmul.f32 %v276_v35, %v184_v36  ;;  %v201_v46 = vsel %vm195_vm3, %v194_v41, 0.0 }
  0xf1   :  { %v196_v42 = vsel %vm195_vm3, %v191_v38, 0.0 }
  0xf2   :  { %v198_v43 = vadd.f32 %v197_v37, %v196_v42  ;;  %v199_v44 = vsel %vm195_vm3, %v193_v40, 0.0 }
  0xf4   :  { %v200_v45 = vadd.f32 %v199_v44, %v198_v43 }
  0xf6   :  { %v202_v47 = vadd.f32 %v201_v46, %v200_v45 }
  0xf8   :  { %v203_v48 = vrot.slane %v202_v47, 4 }
  0xfa   :  { %v204_v49 = vadd.f32 %v203_v48, %v202_v47 }
  0xfc   :  { %v205_v50 = vrot.slane %v204_v49, 2 }
  0xfe   :  { %v206_v51 = vadd.f32 %v205_v50, %v204_v49 }
 0x100   :  { %v207_v52 = vrot.slane %v206_v51, 1 }
 0x102   :  { %v208_v54 = vadd.f32 %v207_v52, %v206_v51 }
 0x104   :  { %v209_v55 = vadd.f32 %v208_v54, %v166_v53 }
 0x106   :  { %211 = vst.msk [vmem:[#allocation2] sm:$0x1] %vm26_vm2, %v209_v55 }
 0x10d   :  { %v215_v57 = vld [vmem:[#allocation2] sm:$0x1] }
 0x10e   :  { %v218_v58 = vadd.f32 %v217_v56, %v215_v57 }
 0x110   :  { %219 = vst.msk [vmem:[#allocation4] sm:$0x1] %vm26_vm2, %v218_v58 }
 0x111   :  { %288 = shalt.err (!%p285_p4)
}
 0x112   :  { %s289_s25 = scalar_lea.hbm %s405_s5, 16 }
 0x113   :  { %p290_p5 = scmp.ne.s32.totalorder %s405_s5, %s289_s25  ;;  %p293_p6 = scmp.lt.u32.totalorder %s289_s25, %s405_s5 }
 0x115   :  { %p295_p7 = pnand %p293_p6, %p290_p5 }
 0x117   :  { %298 = shalt.err (!%p295_p7)
}
 0x118   :  { %229 = dma.vmem_to_hbm [thread:$0]  %s227_s20, 16, %s405_s5, [#allocation5]  }
 0x119   :  { %299 = dma.done.wait [#allocation5], 16  }
 0x11a   :  { %300 = vsyncadd [#allocation5], 4294967280 }
 0x11b   :  { %233 = vsyncpa [#allocation5], 1 }

</bundles_post_ra>
